<compile_context>
chip_gen: v7x
topology: tpu7x:2x2x1
jax: 0.10.0
libtpu: 0.0.40
codegen_flags: <defaults>
</compile_context>

<pallas_src>
import functools

import jax
import jax.numpy as jnp
from jax import lax
from jax.experimental import pallas as pl
from jax.experimental.pallas import tpu as pltpu

NEG_INF = -1e30   # additive-mask sentinel (representable in bf16)
TILE_I = 128      # target-node rows per grid step == lane width of all outputs
LANE = 128        # neighbor sub-tile width == vreg lane count
SUB = 8           # target-node sub-chunk == f32 sublane count


def _pick_tile_j(n_pad):
    for t in (512, 256, 128):
        if n_pad % t == 0:
            return t
    return 128


# --------------------------------------------------------------------------- #
# Per-layer feature transform (MXU): hoisted out of the O(N^2) aggregation.
# --------------------------------------------------------------------------- #
def _transform_kernel(hT_ref, wT_ref, b_ref, negT_ref, baseT_ref, *, feat):
    # m = W_cat^T @ h^T  -> [2F, TILE_N]   (rows 0:F = theta part, F:2F = phi part)
    m = jnp.dot(wT_ref[...], hT_ref[...], preferred_element_type=jnp.float32)
    negT_ref[...] = -m[:feat, :]          # -(x @ W_theta)^T : neighbor term, no bias
    baseT_ref[...] = m + b_ref[...]       # [t^T + b_theta ; p^T + b_phi]


def _transform_layer(hT, wT, bT):
    c, n_pad = hT.shape
    two_f = wT.shape[0]
    f = two_f // 2
    tile_n = TILE_I
    grid = (n_pad // tile_n,)

    return pl.pallas_call(
        functools.partial(_transform_kernel, feat=f),
        out_shape=(jax.ShapeDtypeStruct((f, n_pad), jnp.float32),
                   jax.ShapeDtypeStruct((two_f, n_pad), jnp.float32)),
        grid_spec=pltpu.PrefetchScalarGridSpec(
            num_scalar_prefetch=0,
            grid=grid,
            in_specs=[
                pl.BlockSpec((c, tile_n), lambda i: (0, i)),       # h^T tile
                pl.BlockSpec((two_f, c), lambda i: (0, 0)),        # fused W_theta|W_phi ^T
                pl.BlockSpec((two_f, 1), lambda i: (0, 0)),        # fused biases
            ],
            out_specs=[
                pl.BlockSpec((f, tile_n), lambda i: (0, i)),       # negT (lane-dense)
                pl.BlockSpec((two_f, tile_n), lambda i: (0, i)),   # baseT (lane-dense)
            ],
        ),
        compiler_params=pltpu.CompilerParams(
            dimension_semantics=("parallel",),
            vmem_limit_bytes=16 * 1024 * 1024,
        ),
        cost_estimate=pl.CostEstimate(
            flops=2 * n_pad * c * two_f,
            transcendentals=0,
            bytes_accessed=4 * (c * n_pad + two_f * c + 3 * f * n_pad)),
    )(hT, wT, bT)


# --------------------------------------------------------------------------- #
# Masked neighbor-max aggregation (+ fused ReLU / output Linear / sigmoid).
# --------------------------------------------------------------------------- #
def _aggregate_kernel(amask_ref, negT_ref, baseT_ref, has_ref, *rest,
                      feat, tile_j, is_last):
    if is_last:
        w_out_ref, b_out_ref, out_ref, pmax_ref, red_ref = rest
    else:
        out_ref, pmax_ref, red_ref = rest

    j = pl.program_id(1)
    n_j = pl.num_programs(1)
    n_ic = TILE_I // SUB
    n_jc = tile_j // LANE
    f_chunk = 16 if feat % 16 == 0 else 8
    n_fc = feat // f_chunk

    # ---- init the per-lane-class running max on the first neighbor tile -------
    @pl.when(j == 0)
    def _init():
        def body(c, carry):
            i0 = pl.multiple_of(c * SUB, SUB)
            pmax_ref[pl.ds(i0, SUB), :, :] = jnp.full(
                (SUB, feat, LANE), NEG_INF, jnp.float32)
            return carry
        lax.fori_loop(0, n_ic, body, 0)

    # ---- streamed masked running max: pure elementwise VPU work ---------------
    # pmax[i, f, l] = max over visited neighbor columns j with (j mod 128 == l)
    #                 of (amask[i, j] + negT[f, j]); lane reduce deferred to epilogue.
    # Slabs are [8, f_chunk, 128] (<= 16 f32 vregs) so nothing spills.
    def update(c, carry):
        i0 = pl.multiple_of(c * SUB, SUB)
        for fc in range(n_fc):
            f0 = fc * f_chunk
            p = pmax_ref[pl.ds(i0, SUB), pl.ds(f0, f_chunk), :]
            for jc in range(n_jc):
                mrow = amask_ref[pl.ds(i0, SUB), pl.ds(jc * LANE, LANE)]
                mrow = mrow.astype(jnp.float32)                         # [8, 128]
                nsub = negT_ref[pl.ds(f0, f_chunk), pl.ds(jc * LANE, LANE)]
                p = jnp.maximum(p, mrow[:, None, :] + nsub[None, :, :])
            pmax_ref[pl.ds(i0, SUB), pl.ds(f0, f_chunk), :] = p
        return carry
    lax.fori_loop(0, n_ic, update, 0)

    # ---- epilogue on the last neighbor tile: one lane reduce + fused tail -----
    @pl.when(j == n_j - 1)
    def _epilogue():
        def reduce_body(c, carry):
            i0 = pl.multiple_of(c * SUB, SUB)
            for fc in range(n_fc):
                f0 = fc * f_chunk
                p = pmax_ref[pl.ds(i0, SUB), pl.ds(f0, f_chunk), :]
                red_ref[pl.ds(i0, SUB), pl.ds(f0, f_chunk)] = jnp.max(p, axis=2)
            return carry
        lax.fori_loop(0, n_ic, reduce_body, 0)

        mx = red_ref[...].T                       # [F, TILE_I]  (one small transpose)
        base = baseT_ref[...]                     # [2F, TILE_I]
        theta = base[:feat, :]                    # t_i^T + b_theta
        phi = base[feat:, :]                      # p_i^T + b_phi
        has_nb = has_ref[...] > 0.5               # [1, TILE_I], robust isolation flag
        agg = jnp.where(has_nb, theta + mx, 0.0)  # max_j W_theta(x_i - x_j); 0 if isolated
        h_out = jnp.maximum(phi + agg, 0.0)       # ReLU, [F, TILE_I] lane-dense

        if is_last:
            s = jnp.dot(w_out_ref[...], h_out,
                        preferred_element_type=jnp.float32) + b_out_ref[...]
            out_ref[...] = 0.5 * (jnp.tanh(0.5 * s) + 1.0)   # stable sigmoid, [1, TILE_I]
        else:
            out_ref[...] = h_out                             # lane-dense intermediate


def _aggregate_layer(amask, negT, baseT, has_nb, *, is_last, w_out=None, b_out=None):
    f, n_pad = negT.shape
    two_f = baseT.shape[0]
    assert f % 8 == 0 and n_pad % TILE_I == 0
    tile_j = _pick_tile_j(n_pad)
    ni = n_pad // TILE_I
    nj = n_pad // tile_j

    in_specs = [
        pl.BlockSpec((TILE_I, tile_j), lambda i, j: (i, j)),   # additive mask (bf16)
        pl.BlockSpec((f, tile_j), lambda i, j: (0, j)),        # -(x W_theta)^T
        pl.BlockSpec((two_f, TILE_I), lambda i, j: (0, i)),    # [theta_i^T+b ; phi_i^T+b]
        pl.BlockSpec((1, TILE_I), lambda i, j: (0, i)),        # has-neighbor flag
    ]
    args = [amask, negT, baseT, has_nb]
    if is_last:
        in_specs += [pl.BlockSpec((1, f), lambda i, j: (0, 0)),    # output Linear row
                     pl.BlockSpec((1, 1), lambda i, j: (0, 0))]    # output Linear bias
        args += [w_out, b_out]
        out_shape = jax.ShapeDtypeStruct((1, n_pad), jnp.float32)  # lane-dense probs
        out_specs = pl.BlockSpec((1, TILE_I), lambda i, j: (0, i))
    else:
        out_shape = jax.ShapeDtypeStruct((f, n_pad), jnp.float32)  # lane-dense h^T
        out_specs = pl.BlockSpec((f, TILE_I), lambda i, j: (0, i))

    return pl.pallas_call(
        functools.partial(_aggregate_kernel, feat=f, tile_j=tile_j, is_last=is_last),
        out_shape=out_shape,
        grid_spec=pltpu.PrefetchScalarGridSpec(
            num_scalar_prefetch=0,
            grid=(ni, nj),
            in_specs=in_specs,
            out_specs=out_specs,
            scratch_shapes=[
                pltpu.VMEM((TILE_I, f, LANE), jnp.float32),   # per-lane-class running max
                pltpu.VMEM((TILE_I, f), jnp.float32),         # lane-reduced max (epilogue)
            ],
        ),
        compiler_params=pltpu.CompilerParams(
            dimension_semantics=("parallel", "arbitrary"),
            vmem_limit_bytes=16 * 1024 * 1024,
        ),
        cost_estimate=pl.CostEstimate(
            flops=4 * n_pad * n_pad * f,
            transcendentals=n_pad if is_last else 0,
            bytes_accessed=2 * n_pad * n_pad + 4 * n_pad * f * (ni + 3)),
    )(*args)


# --------------------------------------------------------------------------- #
# Forward pass
# --------------------------------------------------------------------------- #
def point_sampler_forward(x, edge_index, params):
    """x: [N, Cin] f32, edge_index: [2, E] int32 (PyG: row0=source j, row1=target i).

    Returns sampling probabilities [N]."""
    layer_wT, layer_bT, w_out_row, b_out = params
    n = x.shape[0]
    cin_pad = layer_wT[0].shape[1]
    n_pad = max(TILE_I, ((n + TILE_I - 1) // TILE_I) * TILE_I)

    # node features, transposed & zero padded: [C_pad, N_pad] (lane-dense)
    hT = jnp.zeros((cin_pad, n_pad), jnp.float32).at[:x.shape[1], :n].set(x.T)

    # dense ADDITIVE adjacency mask built once, directly in bf16:
    # amask[i, j] = 0 iff edge j->i exists, else -1e30.
    # TODO(synk): CSR + scalar-prefetch segment-max gather for large meshes.
    amask = jnp.full((n_pad, n_pad), NEG_INF, jnp.bfloat16)
    amask = amask.at[edge_index[1], edge_index[0]].set(0.0)
    # explicit "has at least one incoming edge" flag (decoupled from the sentinel)
    has_nb = jnp.zeros((1, n_pad), jnp.float32).at[0, edge_index[1]].set(1.0)

    out = hT
    num_layers = len(layer_wT)
    for l in range(num_layers):
        is_last = l == num_layers - 1
        negT, baseT = _transform_layer(out, layer_wT[l], layer_bT[l])
        out = _aggregate_layer(amask, negT, baseT, has_nb, is_last=is_last,
                               w_out=w_out_row if is_last else None,
                               b_out=b_out if is_last else None)
    return out[0, :n]


def init_params(key, in_channels, out_channels, num_layers):
    """PyTorch Linear-style init (uniform +-1/sqrt(fan_in)).  Weights stored
    transposed (theta/phi fused as [2F, C] per layer) for the lane-dense kernels."""
    f = out_channels
    cin_pad = ((max(in_channels, 1) + 7) // 8) * 8

    def lin(k, fan_in, fan_out):
        bound = 1.0 / (fan_in ** 0.5)
        kw, kb = jax.random.split(k)
        w = jax.random.uniform(kw, (fan_in, fan_out), jnp.float32, -bound, bound)
        b = jax.random.uniform(kb, (1, fan_out), jnp.float32, -bound, bound)
        return w, b

    keys = jax.random.split(key, num_layers + 1)
    layer_wT, layer_bT = [], []
    for l in range(num_layers):
        c_in = in_channels if l == 0 else f
        kt, kp = jax.random.split(keys[l])
        wt, bt = lin(kt, c_in, f)
        wp, bp = lin(kp, c_in, f)
        if l == 0:  # zero-pad layer-0 input channels
            pad = cin_pad - in_channels
            wt = jnp.pad(wt, ((0, pad), (0, 0)))
            wp = jnp.pad(wp, ((0, pad), (0, 0)))
        layer_wT.append(jnp.concatenate([wt, wp], axis=1).T)    # [2F, C]
        layer_bT.append(jnp.concatenate([bt, bp], axis=1).T)    # [2F, 1]
    w_out, b_out = lin(keys[-1], f, 1)                          # Linear(out_channels, 1)
    return layer_wT, layer_bT, w_out.T, b_out                   # w_out as a [1, F] row


def point_sampler_reference(x, edge_index, params):
    """Pure-JAX reference of the same forward pass (correctness check)."""
    layer_wT, layer_bT, w_out_row, b_out = params
    n = x.shape[0]
    f = w_out_row.shape[1]
    cin_pad = layer_wT[0].shape[1]
    hp = jax.lax.Precision.HIGHEST

    h = jnp.zeros((n, cin_pad), jnp.float32).at[:, :x.shape[1]].set(x)
    adj = jnp.zeros((n, n), jnp.bool_).at[edge_index[1], edge_index[0]].set(True)
    has_nb = jnp.any(adj, axis=1, keepdims=True)

    for wT, bT in zip(layer_wT, layer_bT):
        w_cat, b_cat = wT.T, bT.T
        wt, wp = w_cat[:, :f], w_cat[:, f:]
        bt, bp = b_cat[:, :f], b_cat[:, f:]
        t = jnp.dot(h, wt, precision=hp)
        masked = jnp.where(adj[:, :, None], -t[None, :, :], -jnp.inf)
        mx = jnp.max(masked, axis=1)
        agg = jnp.where(has_nb, t + bt + mx, 0.0)
        h = jnp.maximum(jnp.dot(h, wp, precision=hp) + bp + agg, 0.0)
    scores = jnp.dot(h, w_out_row.T, precision=hp) + b_out
    return jax.nn.sigmoid(scores)[:, 0]


if __name__ == "__main__":
    in_channels = 3      # xyz coordinates
    out_channels = 32
    num_layers = 3
    n_nodes = 200        # pads to 256 -> ni = 2 (even, v7x-friendly), tile_j = 256
    n_edges = 600

    key = jax.random.PRNGKey(0)
    kx, ke, kp = jax.random.split(key, 3)

    x = jax.random.normal(kx, (n_nodes, in_channels), jnp.float32)
    edge_index = jax.random.randint(ke, (2, n_edges), 0, n_nodes, jnp.int32)
    params = init_params(kp, in_channels, out_channels, num_layers)

    probs = point_sampler_forward(x, edge_index, params)
    probs = jax.block_until_ready(probs)

    ref = point_sampler_reference(x, edge_index, params)

    assert probs.shape == (n_nodes,)
    assert bool(jnp.all(jnp.isfinite(probs)))
    assert bool(jnp.all((probs >= 0.0) & (probs <= 1.0)))
    assert bool(jnp.max(jnp.abs(probs - ref)) < 2e-2)
    print("KERNEL_OK")
</pallas_src>

<mosaic_0001>
module attributes {stable_mosaic.version = 11 : i64} {
  func.func @_transform_kernel(%arg0: i32, %arg1: memref<8x128xf32, #tpu.memory_space<vmem>>, %arg2: memref<64x8xf32, #tpu.memory_space<vmem>>, %arg3: memref<64x1xf32, #tpu.memory_space<vmem>>, %arg4: memref<32x128xf32, #tpu.memory_space<vmem>>, %arg5: memref<64x128xf32, #tpu.memory_space<vmem>>) attributes {dimension_semantics = [#tpu.dimension_semantics<parallel>], iteration_bounds = array<i64: 2>, scalar_prefetch = 0 : i64, scratch_operands = 0 : i64, tpu.core_type = #tpu.core_type<tc>, window_params = [{transform_indices = @transform_0, window_bounds = array<i64: 8, 128>}, {pipeline_mode = #tpu.pipeline_mode<synchronous>, transform_indices = @transform_1, window_bounds = array<i64: 64, 8>}, {pipeline_mode = #tpu.pipeline_mode<synchronous>, transform_indices = @transform_2, window_bounds = array<i64: 64, 1>}, {transform_indices = @transform_3, window_bounds = array<i64: 32, 128>}, {transform_indices = @transform_4, window_bounds = array<i64: 64, 128>}]} {
    %c0 = arith.constant 0 : index
    %c0_0 = arith.constant 0 : index
    %0 = vector.load %arg2[%c0, %c0_0] : memref<64x8xf32, #tpu.memory_space<vmem>>, vector<64x8xf32>
    %c0_1 = arith.constant 0 : index
    %c0_2 = arith.constant 0 : index
    %1 = vector.load %arg1[%c0_1, %c0_2] : memref<8x128xf32, #tpu.memory_space<vmem>>, vector<8x128xf32>
    %cst = arith.constant dense<0.000000e+00> : vector<64x128xf32>
    %2 = tpu.matmul %0, %1, %cst {dimension_numbers = #tpu.dot_dimension_numbers<[1], [0], [0], [1], [0, 0, 1, 1], [], []>} : vector<64x8xf32>, vector<8x128xf32>, vector<64x128xf32> -> vector<64x128xf32>
    %3 = vector.extract_strided_slice %2 {offsets = [0, 0], sizes = [32, 128], strides = [1, 1]} : vector<64x128xf32> to vector<32x128xf32>
    %cst_3 = arith.constant 0.000000e+00 : f32
    %4 = vector.broadcast %cst_3 : f32 to vector<32x128xf32>
    %5 = arith.subf %4, %3 : vector<32x128xf32>
    %c0_4 = arith.constant 0 : index
    %c0_5 = arith.constant 0 : index
    %6 = vector.load %arg4[%c0_4, %c0_5] : memref<32x128xf32, #tpu.memory_space<vmem>>, vector<32x128xf32>
    tpu.vector_store %arg4[%c0_4, %c0_5], %5 {strides = array<i32>} : memref<32x128xf32, #tpu.memory_space<vmem>>, vector<32x128xf32>,
    %c0_6 = arith.constant 0 : index
    %c0_7 = arith.constant 0 : index
    %7 = vector.load %arg3[%c0_6, %c0_7] : memref<64x1xf32, #tpu.memory_space<vmem>>, vector<64x1xf32>
    %8 = vector.broadcast %7 : vector<64x1xf32> to vector<64x128xf32>
    %9 = arith.addf %2, %8 : vector<64x128xf32>
    %c0_8 = arith.constant 0 : index
    %c0_9 = arith.constant 0 : index
    %10 = vector.load %arg5[%c0_8, %c0_9] : memref<64x128xf32, #tpu.memory_space<vmem>>, vector<64x128xf32>
    tpu.vector_store %arg5[%c0_8, %c0_9], %9 {strides = array<i32>} : memref<64x128xf32, #tpu.memory_space<vmem>>, vector<64x128xf32>,
    return
  }
  func.func @transform_0(%arg0: i32) -> (i32, i32) {
    %c0_i32 = arith.constant 0 : i32
    %c0_i32_0 = arith.constant 0 : i32
    return %c0_i32, %arg0 : i32, i32
  }
  func.func @transform_1(%arg0: i32) -> (i32, i32) {
    %c0_i32 = arith.constant 0 : i32
    %c0_i32_0 = arith.constant 0 : i32
    %c0_i32_1 = arith.constant 0 : i32
    return %c0_i32, %c0_i32_0 : i32, i32
  }
  func.func @transform_2(%arg0: i32) -> (i32, i32) {
    %c0_i32 = arith.constant 0 : i32
    %c0_i32_0 = arith.constant 0 : i32
    %c0_i32_1 = arith.constant 0 : i32
    return %c0_i32, %c0_i32_0 : i32, i32
  }
  func.func @transform_3(%arg0: i32) -> (i32, i32) {
    %c0_i32 = arith.constant 0 : i32
    %c0_i32_0 = arith.constant 0 : i32
    return %c0_i32, %arg0 : i32, i32
  }
  func.func @transform_4(%arg0: i32) -> (i32, i32) {
    %c0_i32 = arith.constant 0 : i32
    %c0_i32_0 = arith.constant 0 : i32
    return %c0_i32, %arg0 : i32, i32
  }
}

</mosaic_0001>

<bundles_post_ra>
// kernel: tpu_custom_call.1
= control target key start
LH: loop header
LB: loop body
LE: loop exit
PB: predicated region body
PF: predicated region fallthrough
CT: control target
= control target key end

     0   :  { %10 = vsyncpa [#allocation3], 0  ;;  %s972_s0 = inlined_call_operand.vmem [shape: f32[8,256], index: 0, kind: input, shape index: {}]   ;;  %s973_s1 = inlined_call_operand.vmem [shape: f32[64,8], index: 1, kind: input, shape index: {}]   ;;  %s974_s2 = inlined_call_operand.vmem [shape: f32[64,1], index: 2, kind: input, shape index: {}]   ;;  %s975_s3 = inlined_call_operand.hbm [shape: f32[32,256], index: 3, kind: output, shape index: {0}]   ;;  %s976_s4 = inlined_call_operand.hbm [shape: f32[64,256], index: 4, kind: output, shape index: {1}]  }
   0x1   :  { %12 = vsyncpa [#allocation3 + $0x1], 0 }
   0x2   :  { %13 = vsyncpa [#allocation5], 0 }
   0x3   :  { %15 = vsyncpa [#allocation5 + $0x1], 0  ;;  %s765_s15 = smov 0   ;;  %s767_s16 = smov 0  }
   0x4   :  { %s769_s17 = smov 0   ;;  %s771_s18 = smov 0  }
   0x5 LB: > { %s786_s19 = sadd.s32 4294967295, %s732_s18   ;;  %s542_s20 = sadd.s32 4294967294, %s732_s18   ;;  %s732_s18 = sphi %s771_s18, %s982_s18   ;;  %s728_s17 = sphi %s769_s17, %s981_s17   ;;  %s724_s16 = sphi %s767_s16, %s980_s16   ;;  %s720_s15 = sphi %s765_s15, %s979_s15  }
   0x6   : > { %s790_s21 = sadd.s32 1, %s732_s18   ;;  %s96_s22 = sadd.s32 1, %s728_s17 }
   0x7   : > { %s93_s23 = ssub.s32 %s732_s18, %s790_s21  ;;  %p106_p0 = scmp.ne.s32.totalorder %s728_s17, %s724_s16 }
   0x8   : > { %p94_p1 = scmp.eq.s32.totalorder %s93_s23, 0  ;;  %p107_p2 = scmp.eq.s32.totalorder %s786_s19, 1 }
   0x9   : > { %p112_p3 = scmp.ne.s32.totalorder %s724_s16, %s720_s15  ;;  %p113_p4 = scmp.eq.s32.totalorder %s542_s20, 1 }
   0xa   : > { %s801_s24 = scalar_select %p94_p1, %s728_s17, %s96_s22  }
   0xb   : > { %p803_p5 = por %p107_p2, %p106_p0  ;;  %p807_p6 = por %p113_p4, %p112_p3 }
   0xc   : > { %p545_p7 = scmp.ge.s32.totalorder %s732_s18, 1  ;;  %p170_p8 = scmp.lt.s32.totalorder %s732_s18, 3 }
   0xe   : > { %p171_p9 = pnand %p545_p7, %p170_p8 }
   0xf   : > { %p200_p10 = scmp.lt.s32.totalorder (!%p171_p9), %s786_s19, 1  ;;  %v204_v0 = vld [vmem:[%s973_s1] sm:$0xff] (!%p171_p9)  ;;  %vm213_vm0 = vcmask (!%p171_p9), 64512   ;;  %v734_v2 = vmov (!%p171_p9), 0   ;;  %v353_v3 = vld [vmem:[%s974_s2 + $0x10] sm:$0xff] (!%p171_p9)  ;;  %v205_v6 = vld [vmem:[%s973_s1 + $0x8] sm:$0xff] (!%p171_p9) }
  0x10   : > { %174 = sbr.rel (%p171_p9) target bundleno = 288 (0x120), region = 32  ;;  %v208_v1 = vld [vmem:[%s973_s1 + $0x20] sm:$0xff] (!%p171_p9)  ;;  %574 = vmatprep.mubr.msk.f32.mxu0 (!%p171_p9), %vm213_vm0, %v204_v0  ;;  %637 = vset.pattern.permute.xlu1 (!%p171_p9), %v734_v2  ;;  %v209_v7 = vld [vmem:[%s973_s1 + $0x28] sm:$0xff] (!%p171_p9)  ;;  %v206_v8 = vld [vmem:[%s973_s1 + $0x10] sm:$0xff] (!%p171_p9)  ;;  %s875_s30 = sand.u32 (!%p171_p9), 1, %s724_s16  }
  0x11   : > { %580 = vmatprep.mubr.msk.f32.mxu1 (!%p171_p9), %vm213_vm0, %v208_v1  ;;  %636 = vset.pattern.permute.xlu0 (!%p171_p9), %v734_v2  ;;  %v351_v4 = vld [vmem:[%s974_s2] sm:$0xff] (!%p171_p9)  ;;  %v210_v9 = vld [vmem:[%s973_s1 + $0x30] sm:$0xff] (!%p171_p9)  ;;  %v354_v10 = vld [vmem:[%s974_s2 + $0x18] sm:$0xff] (!%p171_p9)  ;;  %s547_s6 = sshll.u32 (!%p171_p9), %s875_s30, 6  ;;  %s559_s9 = sshll.u32 (!%p171_p9), %s786_s19, 7 }
  0x12   : > { %371 = vperm.xlu1 (!%p171_p9), %637, %v353_v3   ;;  %361 = vperm.xlu0 (!%p171_p9), %636, %v351_v4   ;;  %v352_v11 = vld [vmem:[%s974_s2 + $0x8] sm:$0xff] (!%p171_p9)  ;;  %v207_v12 = vld [vmem:[%s973_s1 + $0x18] sm:$0xff] (!%p171_p9)  ;;  %v355_v15 = vld [vmem:[%s974_s2 + $0x20] sm:$0xff] (!%p171_p9)  ;;  %s898_s22 = scalar_lea.hbm (!%p171_p9), %s976_s4, %s559_s9  ;;  %s416_s23 = scalar_lea.sflag (!%p171_p9), [#allocation3], %s875_s30 }
  0x13   : > { %v211_v13 = vld [vmem:[%s973_s1 + $0x38] sm:$0xff] (!%p171_p9)  ;;  %v356_v14 = vld [vmem:[%s974_s2 + $0x28] sm:$0xff] (!%p171_p9)  ;;  %v357_v17 = vld [vmem:[%s974_s2 + $0x30] sm:$0xff] (!%p171_p9)  ;;  %s735_s28 = smov (!%p171_p9), [#allocation2]  }
  0x14   : > { %v358_v16 = vld [vmem:[%s974_s2 + $0x38] sm:$0xff] (!%p171_p9)  ;;  %s642_s29 = sshll.u32 (!%p171_p9), %s735_s28, 4  ;;  %s643_s29 = int_to_ptr.vmem [resolvable:$false] %s642_s29 }
  0x16   : > { %376 = vperm.xlu1 (!%p171_p9), %637, %v354_v10   ;;  %366 = vperm.xlu0 (!%p171_p9), %636, %v352_v11  }
  0x17   : > { %s201_s5 = scalar_select %p200_p10, %s786_s19, 1 }
  0x19   : > { %s548_s10 = sshll.u32 %s201_s5, 3  ;;  %s546_s5 = sshll.u32 %s875_s30, 5 }
  0x1a   : > { %s203_s13 = scalar_lea.vmem %s972_s0, %s548_s10  ;;  %386 = vperm.xlu1 %637, %v356_v14   ;;  %381 = vperm.xlu0 %636, %v355_v15   ;;  %s879_s7 = scalar_lea.vmem [#allocation2], %s546_s5 }
  0x1b   : > { %v212_v5 = vld [vmem:[%s203_s13] sm:$0xff]  ;;  %s433_s8 = sshll.u32 %s879_s7, 4  ;;  %s199_s10 = scalar_lea.vmem [#allocation4], %s547_s6  ;;  %s884_s8 = int_to_ptr.vmem [resolvable:$true] %s433_s8 }
  0x1c   : > { %572 = vmatprep.subr.mxu0 %v212_v5  ;;  %586 = vmatprep.subr.mxu1 %v212_v5  ;;  %s448_s11 = sshll.u32 %s199_s10, 4  ;;  %s890_s13 = scalar_lea.hbm %s975_s3, %s559_s9  ;;  %s892_s11 = int_to_ptr.vmem [resolvable:$true] %s448_s11 }
  0x1d   : > { %573 = vmatpush3.msra.mxu0 %v212_v5  ;;  %587 = vmatpush3.msra.mxu1 %v212_v5  ;;  %s638_s27 = scalar_lea.vmem %s884_s8, 512  ;;  %s644_s5 = scalar_lea.vmem %s643_s29, 1024 }
  0x1e   : > { %575 = vmatmul.mubr.msk.f32.vlgmr.msra.gmra.mrb[0].mxu0 %vm213_vm0, %v205_v6  ;;  %581 = vmatmul.mubr.msk.f32.vlgmr.msra.gmra.mrb[0].mxu1 %vm213_vm0, %v209_v7  ;;  %p639_p11 = scmp.ne.s32.totalorder %s884_s8, %s638_s27  ;;  %p645_p0 = scmp.lt.s32.totalorder %s884_s8, %s643_s29 }
  0x1f   : > { %577 = vmatprep.mubr.msk.f32.mxu0 %vm213_vm0, %v206_v8  ;;  %583 = vmatprep.mubr.msk.f32.mxu1 %vm213_vm0, %v210_v9  ;;  %p646_p1 = scmp.lt.s32.totalorder %s644_s5, %s638_s27 }
  0x20   : > { %396 = vperm.xlu1 %637, %v358_v16   ;;  %391 = vperm.xlu0 %636, %v357_v17   ;;  %p640_p12 = pnand %p639_p11, %p803_p5 }
  0x21   : > { %p647_p2 = por %p646_p1, %p645_p0 }
  0x22   : > { %578 = vmatmul.mubr.msk.f32.gmra.mrb[2].mxu0 %vm213_vm0, %v207_v12  ;;  %584 = vmatmul.mubr.msk.f32.gmra.mrb[2].mxu1 %vm213_vm0, %v211_v13  ;;  %p641_p13 = pneg %p640_p12 }
  0x24   : > { %p648_p3 = pnand %p647_p2, %p641_p13 }
  0x91   : > { %v372_v18 = vpop.permute.xlu1 %371  ;;  %v362_v19 = vpop.permute.xlu0 %361 }
  0x95   : > { %v377_v20 = vpop.permute.xlu1 %376  ;;  %v367_v21 = vpop.permute.xlu0 %366 }
  0x99   : > { %v387_v22 = vpop.permute.xlu1 %386  ;;  %v382_v23 = vpop.permute.xlu0 %381 }
  0x9f   : > { %v397_v34 = vpop.permute.xlu1 %396  ;;  %v392_v35 = vpop.permute.xlu0 %391 }
  0xf1   : > { %v576_v24 = vpop.f32.mrb[0].mxu0  ;;  %v582_v25 = vpop.f32.mrb[0].mxu1 }
  0xf2   : > { %v344_v26 = vsub.f32 0.0, %v576_v24  ;;  %v400_v27 = vadd.f32 %v576_v24, %v367_v21  ;;  %v404_v28 = vadd.f32 %v582_v25, %v387_v22  ;;  %v304_v29 = vpop.f32.mrb[1].mxu0  ;;  %v324_v30 = vpop.f32.mrb[1].mxu1 }
  0xf3   : > { %v343_v31 = vsub.f32 0.0, %v304_v29  ;;  %v399_v32 = vadd.f32 %v362_v19, %v304_v29  ;;  %v403_v33 = vadd.f32 %v382_v23, %v324_v30 }
  0xf4   : > { %348 = vst [vmem:[%s879_s7 + $0x8] sm:$0xff] %v344_v26  ;;  %408 = vst [vmem:[%s199_s10 + $0x8] sm:$0xff] %v400_v27 }
  0xf5   : > { %412 = vst [vmem:[%s199_s10 + $0x28] sm:$0xff] %v404_v28  ;;  %347 = vst [vmem:[%s879_s7] sm:$0xff] %v343_v31  ;;  %v579_v36 = vpop.f32.mrb[2].mxu0  ;;  %v585_v37 = vpop.f32.mrb[2].mxu1 }
  0xf6   : > { %407 = vst [vmem:[%s199_s10] sm:$0xff] %v399_v32  ;;  %411 = vst [vmem:[%s199_s10 + $0x20] sm:$0xff] %v403_v33  ;;  %v346_v38 = vsub.f32 0.0, %v579_v36  ;;  %v402_v39 = vadd.f32 %v579_v36, %v377_v20  ;;  %v406_v40 = vadd.f32 %v585_v37, %v397_v34  ;;  %v314_v41 = vpop.f32.mrb[3].mxu0  ;;  %v334_v42 = vpop.f32.mrb[3].mxu1 }
  0xf7   : > { %v345_v43 = vsub.f32 0.0, %v314_v41  ;;  %v401_v44 = vadd.f32 %v372_v18, %v314_v41  ;;  %v405_v45 = vadd.f32 %v392_v35, %v334_v42 }
  0xf8   : > { %350 = vst [vmem:[%s879_s7 + $0x18] sm:$0xff] %v346_v38  ;;  %410 = vst [vmem:[%s199_s10 + $0x18] sm:$0xff] %v402_v39 }
  0xf9   : > { %414 = vst [vmem:[%s199_s10 + $0x38] sm:$0xff] %v406_v40  ;;  %349 = vst [vmem:[%s879_s7 + $0x10] sm:$0xff] %v345_v43 }
  0xfa   : > { %409 = vst [vmem:[%s199_s10 + $0x10] sm:$0xff] %v401_v44  ;;  %413 = vst [vmem:[%s199_s10 + $0x30] sm:$0xff] %v405_v45 }
  0xfb   : > { %651 = shalt.err (!%p648_p3)
}
  0xfc   : > { %s652_s6 = scalar_lea.hbm %s890_s13, 512  ;;  %s656_s10 = scalar_lea.hbm %s975_s3, 1024 }
  0xfd   : > { %p653_p4 = scmp.ne.s32.totalorder %s890_s13, %s652_s6  ;;  %p657_p9 = scmp.lt.u32.totalorder %s890_s13, %s975_s3 }
  0xfe   : > { %p658_p10 = scmp.lt.u32.totalorder %s656_s10, %s652_s6  ;;  %p660_p12 = scmp.lt.u32.totalorder %s652_s6, %s890_s13 }
  0xff   : > { %p654_p7 = pnand %p653_p4, %p803_p5 }
 0x100   : > { %p659_p11 = por %p658_p10, %p657_p9 }
 0x101   : > { %p655_p8 = pneg %p654_p7 }
 0x102   : > { %p661_p13 = por %p660_p12, %p659_p11 }
 0x104   : > { %p662_p0 = pnand %p661_p13, %p655_p8 }
 0x106   : > { %665 = shalt.err (!%p662_p0)
}
 0x107   : > { %s736_s14 = smov 128   ;;  %s737_s20 = smov 256  }
 0x108   : > { %s738_s27 = smov 8   ;;  %s421_s28 = scalar_lea.sflag [#allocation5], %s875_s30 }
 0x109   : > { %588 = dma.vmem_to_hbm [thread:$0]  (%p803_p5), %s884_s8, 512, %s890_s13, %s416_s23, %s736_s14, %s737_s20, %s738_s27  }
 0x10a   : > { %s666_s29 = scalar_lea.vmem %s892_s11, 1024  ;;  %s739_s5 = smov [#allocation4]  }
 0x10b   : > { %p667_p1 = scmp.ne.s32.totalorder %s892_s11, %s666_s29  ;;  %s670_s6 = sshll.u32 %s739_s5, 4  ;;  %s671_s6 = int_to_ptr.vmem [resolvable:$false] %s670_s6 }
 0x10c   : > { %s672_s7 = scalar_lea.vmem %s671_s6, 2048  ;;  %p673_p4 = scmp.lt.s32.totalorder %s892_s11, %s671_s6 }
 0x10d   : > { %p668_p2 = pnand %p667_p1, %p803_p5  ;;  %p674_p7 = scmp.lt.s32.totalorder %s672_s7, %s666_s29 }
 0x10f   : > { %p669_p3 = pneg %p668_p2  ;;  %p675_p8 = por %p674_p7, %p673_p4 }
 0x111   : > { %p676_p9 = pnand %p675_p8, %p669_p3 }
 0x113   : > { %679 = shalt.err (!%p676_p9)
}
 0x114   : > { %s680_s8 = scalar_lea.hbm %s898_s22, 1024  ;;  %s684_s9 = scalar_lea.hbm %s976_s4, 2048 }
 0x115   : > { %p681_p10 = scmp.ne.s32.totalorder %s898_s22, %s680_s8  ;;  %p685_p13 = scmp.lt.u32.totalorder %s898_s22, %s976_s4 }
 0x116   : > { %p686_p0 = scmp.lt.u32.totalorder %s684_s9, %s680_s8  ;;  %p688_p2 = scmp.lt.u32.totalorder %s680_s8, %s898_s22 }
 0x117   : > { %p682_p11 = pnand %p681_p10, %p803_p5 }
 0x118   : > { %p687_p1 = por %p686_p0, %p685_p13 }
 0x119   : > { %p683_p12 = pneg %p682_p11 }
 0x11a   : > { %p689_p3 = por %p688_p2, %p687_p1 }
 0x11c   : > { %p690_p4 = pnand %p689_p3, %p683_p12 }
 0x11e   : > { %693 = shalt.err (!%p690_p4)
}
 0x11f   : > { %589 = dma.vmem_to_hbm [thread:$0]  (%p803_p5), %s892_s11, 1024, %s898_s22, %s421_s28, %s736_s14, %s737_s20, %s738_s27  }
 0x120 PF: > { %p599_p7 = scmp.ge.s32.totalorder %s732_s18, 2  ;;  %s463_s12 = sand.u32 1, %s720_s15  }
 0x121   : > { %s464_s29 = scalar_lea.sflag [#allocation3], %s463_s12 }
 0x122   : > { %p593_p8 = pnand %p599_p7, %p807_p6 }
 0x124   : > { %711 = dma.done.wait (!%p593_p8), %s464_s29, 512  }
 0x125   : > { %713 = vsyncadd (!%p593_p8), %s464_s29, 4294966784  ;;  %s473_s25 = scalar_lea.sflag [#allocation5], %s463_s12 }
 0x126   : > { %715 = dma.done.wait (!%p593_p8), %s473_s25, 1024  }
 0x127   : > { %717 = vsyncadd (!%p593_p8), %s473_s25, 4294966272  ;;  %p18_p5 = scmp.ge.s32.totalorder %s790_s21, 4   ;;  %s979_s15 = smov %s724_s16 }
 0x128   : > { %s980_s16 = smov %s728_s17  ;;  %s981_s17 = smov %s801_s24 }
 0x129   : > { %s982_s18 = smov %s790_s21  ;;  %20 = sbr.rel (!%p18_p5) target bundleno = 5 (0x5), region = 84 }
 0x130   :  { %478 = vsyncpa [#allocation3], 1 }
 0x131   :  { %480 = vsyncpa [#allocation3 + $0x1], 1 }
 0x132   :  { %481 = vsyncpa [#allocation5], 1 }
 0x133   :  { %483 = vsyncpa [#allocation5 + $0x1], 1 }

</bundles_post_ra>
